<compile_context>
chip_gen: v6e
topology: v6e:2x2x1
jax: 0.10.0
libtpu: 0.0.40
codegen_flags: <defaults>
</compile_context>

<pallas_src>
import functools

import jax
import jax.numpy as jnp
from jax.experimental import pallas as pl
from jax.experimental.pallas import tpu as pltpu

_LANE = 128      # vreg lane width
_SUBLANE = 8     # vreg sublane count (f32)
_MAX_TB = 2048   # batch-tile cap: 2048 x 16 f32 = 128 KiB per x tile (VMEM is a non-issue)


def _round_up(x, m):
    return ((x + m - 1) // m) * m


def _mlp_kernel(x_ref, w1s_ref, b1_ref, w2_ref, b2_ref, w3_ref, b3_ref, o_ref):
    # Layer 1: state @ W1_state + (b1 + W1_action[action])  (one-hot/concat folded away)
    h = jnp.dot(x_ref[...], w1s_ref[...], preferred_element_type=jnp.float32)
    h = jnp.maximum(h + b1_ref[...], 0.0)
    # Layer 2
    h = jnp.dot(h, w2_ref[...], preferred_element_type=jnp.float32)
    h = jnp.maximum(h + b2_ref[...], 0.0)
    # Layer 3: output kept at its true width (masked vst is not the binding slot)
    out = jnp.dot(h, w3_ref[...], preferred_element_type=jnp.float32) + b3_ref[...]
    o_ref[...] = out.astype(o_ref.dtype)


@jax.jit
def forward_dynamics_pallas(state, action, padded_params):
    """state: [B, state_dim] f32, action: scalar int index. Returns [B, state_dim]."""
    w1s, w1a, b1, w2, b2, w3, b3 = padded_params
    s8, h_pad = w1s.shape          # state-feature dim (padded to 8), padded hidden
    o_dim = w3.shape[1]            # true output width (== state_dim)
    action_dim = w1a.shape[0]

    B, s_dim = state.shape

    # ---- Fold the action one-hot into the layer-1 bias (host-side, ~512 B). ----
    # Clamp guards against out-of-range action indices (no silent OOB in-kernel).
    a = jnp.clip(jnp.asarray(action, jnp.int32), 0, action_dim - 1)
    b1_eff = b1 + jax.lax.dynamic_slice_in_dim(w1a, a, 1, axis=0)       # [1, h_pad]

    # ---- Batch tiling: bounded padding waste, >=2 grid steps when B > 8. ----
    b8 = _round_up(B, _SUBLANE)
    n_tiles = pl.cdiv(b8, _MAX_TB)
    if b8 > _SUBLANE:
        n_tiles = max(n_tiles, 2)          # let v7x megacore split the batch
    tb = _round_up(pl.cdiv(b8, n_tiles), _SUBLANE)
    b_pad = n_tiles * tb                   # waste < 8 rows per tile beyond b8

    # ---- Pad only what is actually needed (batch rows; feature cols usually no-op). ----
    pad_rows, pad_cols = b_pad - B, s8 - s_dim
    x = state if (pad_rows == 0 and pad_cols == 0) else jnp.pad(
        state, ((0, pad_rows), (0, pad_cols)))

    out = pl.pallas_call(
        _mlp_kernel,
        out_shape=jax.ShapeDtypeStruct((b_pad, o_dim), jnp.float32),
        grid=(n_tiles,),
        in_specs=[
            pl.BlockSpec((tb, s8), lambda i: (i, 0)),        # state tile (true width)
            pl.BlockSpec((s8, h_pad), lambda i: (0, 0)),     # W1 (state rows), resident
            pl.BlockSpec((1, h_pad), lambda i: (0, 0)),      # b1 + W1_action[a]
            pl.BlockSpec((h_pad, h_pad), lambda i: (0, 0)),  # W2
            pl.BlockSpec((1, h_pad), lambda i: (0, 0)),      # b2
            pl.BlockSpec((h_pad, o_dim), lambda i: (0, 0)),  # W3 (true output width)
            pl.BlockSpec((1, o_dim), lambda i: (0, 0)),      # b3
        ],
        out_specs=pl.BlockSpec((tb, o_dim), lambda i: (i, 0)),
        compiler_params=pltpu.CompilerParams(
            dimension_semantics=("parallel",),               # batch across TCs (v7x)
        ),
    )(x, w1s, b1_eff, w2, b2, w3, b3)

    return out if b_pad == B else out[:B]


def init_params(key, state_dim, action_dim, hidden_dim=64):
    """Unpadded params, PyTorch nn.Linear-like uniform init. W stored [in, out]."""
    in_dim = state_dim + action_dim
    dims = [(in_dim, hidden_dim), (hidden_dim, hidden_dim), (hidden_dim, state_dim)]
    params = []
    keys = jax.random.split(key, 2 * len(dims))
    for i, (din, dout) in enumerate(dims):
        bound = 1.0 / jnp.sqrt(jnp.float32(din))
        w = jax.random.uniform(keys[2 * i], (din, dout), jnp.float32, -bound, bound)
        b = jax.random.uniform(keys[2 * i + 1], (1, dout), jnp.float32, -bound, bound)
        params += [w, b]
    return tuple(params)


def pad_params(params, state_dim, action_dim):
    """One-time layout prep.

    Only the weights' hidden dims are padded to 128 lanes (they are tiny and
    VMEM-resident).  The state-facing dims stay at (near-)true width so the
    per-call HBM traffic for activations is not inflated.
    """
    w1, b1, w2, b2, w3, b3 = params
    hidden = w1.shape[1]
    s8 = _round_up(state_dim, _SUBLANE)          # 16 -> 16 (no-op for this module)
    h_pad = _round_up(hidden, _LANE)

    def pad2(a, r, c):
        return jnp.zeros((r, c), jnp.float32).at[: a.shape[0], : a.shape[1]].set(a)

    return (
        pad2(w1[:state_dim], s8, h_pad),         # W1 state rows   [s8, h_pad]
        pad2(w1[state_dim:], action_dim, h_pad), # W1 action rows  [action_dim, h_pad] (host gather)
        pad2(b1, 1, h_pad),                      # b1
        pad2(w2, h_pad, h_pad),                  # W2
        pad2(b2, 1, h_pad),                      # b2
        pad2(w3, h_pad, state_dim),              # W3 (output cols stay at true width)
        jnp.asarray(b3, jnp.float32),            # b3 [1, state_dim]
    )


def forward_dynamics_model(state, action, padded_params):
    """Mirrors ForwardDynamicsModel.forward(state, action)."""
    state = jnp.asarray(state, jnp.float32)
    if state.ndim == 1:
        state = state[None, :]
    return forward_dynamics_pallas(state, action, padded_params)


def _reference(state, action, params, action_dim):
    """Pure-JAX reference: explicit one-hot + concat, unpadded weights."""
    w1, b1, w2, b2, w3, b3 = params
    one_hot = jnp.zeros((state.shape[0], action_dim), jnp.float32).at[:, action].set(1.0)
    x = jnp.concatenate([state, one_hot], axis=1)
    h = jnp.maximum(x @ w1 + b1, 0.0)
    h = jnp.maximum(h @ w2 + b2, 0.0)
    return h @ w3 + b3


if __name__ == "__main__":
    # Small, module-consistent shapes: state_dim=16, action_dim=3, hidden_dim=64.
    state_dim, action_dim, hidden_dim = 16, 3, 64

    key = jax.random.PRNGKey(0)
    k_param, k_state1, k_state2 = jax.random.split(key, 3)
    params = init_params(k_param, state_dim, action_dim, hidden_dim)
    padded = pad_params(params, state_dim, action_dim)

    # Case 1: tiny deployed-style batch (B=2), single grid step.
    state = jax.random.normal(k_state1, (2, state_dim), jnp.float32)
    action = 1
    out = jax.block_until_ready(forward_dynamics_model(state, action, padded))
    ref = _reference(state, action, params, action_dim)
    assert out.shape == (2, state_dim)
    assert jnp.allclose(out, ref, atol=1e-5), "mismatch vs JAX reference (B=2)"

    # Case 2: non-aligned batch (B=20) -> 2 grid steps, batch padding + row trim.
    state2 = jax.random.normal(k_state2, (20, state_dim), jnp.float32)
    action2 = 2
    out2 = jax.block_until_ready(forward_dynamics_model(state2, action2, padded))
    ref2 = _reference(state2, action2, params, action_dim)
    assert out2.shape == (20, state_dim)
    assert jnp.allclose(out2, ref2, atol=1e-5), "mismatch vs JAX reference (B=20)"

    print("KERNEL_OK")
</pallas_src>

<mosaic_0001>
module attributes {stable_mosaic.version = 11 : i64} {
  func.func @_mlp_kernel(%arg0: i32, %arg1: memref<8x16xf32, #tpu.memory_space<vmem>>, %arg2: memref<16x128xf32, #tpu.memory_space<vmem>>, %arg3: memref<1x128xf32, #tpu.memory_space<vmem>>, %arg4: memref<128x128xf32, #tpu.memory_space<vmem>>, %arg5: memref<1x128xf32, #tpu.memory_space<vmem>>, %arg6: memref<128x16xf32, #tpu.memory_space<vmem>>, %arg7: memref<1x16xf32, #tpu.memory_space<vmem>>, %arg8: memref<8x16xf32, #tpu.memory_space<vmem>>) attributes {dimension_semantics = [#tpu.dimension_semantics<parallel>], iteration_bounds = array<i64: 1>, scalar_prefetch = 0 : i64, scratch_operands = 0 : i64, tpu.core_type = #tpu.core_type<tc>, window_params = [{transform_indices = @transform_0, window_bounds = array<i64: 8, 16>}, {pipeline_mode = #tpu.pipeline_mode<synchronous>, transform_indices = @transform_1, window_bounds = array<i64: 16, 128>}, {pipeline_mode = #tpu.pipeline_mode<synchronous>, transform_indices = @transform_2, window_bounds = array<i64: 1, 128>}, {pipeline_mode = #tpu.pipeline_mode<synchronous>, transform_indices = @transform_3, window_bounds = array<i64: 128, 128>}, {pipeline_mode = #tpu.pipeline_mode<synchronous>, transform_indices = @transform_4, window_bounds = array<i64: 1, 128>}, {pipeline_mode = #tpu.pipeline_mode<synchronous>, transform_indices = @transform_5, window_bounds = array<i64: 128, 16>}, {pipeline_mode = #tpu.pipeline_mode<synchronous>, transform_indices = @transform_6, window_bounds = array<i64: 1, 16>}, {transform_indices = @transform_7, window_bounds = array<i64: 8, 16>}]} {
    %c0 = arith.constant 0 : index
    %c0_0 = arith.constant 0 : index
    %0 = vector.load %arg1[%c0, %c0_0] : memref<8x16xf32, #tpu.memory_space<vmem>>, vector<8x16xf32>
    %c0_1 = arith.constant 0 : index
    %c0_2 = arith.constant 0 : index
    %1 = vector.load %arg2[%c0_1, %c0_2] : memref<16x128xf32, #tpu.memory_space<vmem>>, vector<16x128xf32>
    %cst = arith.constant dense<0.000000e+00> : vector<8x128xf32>
    %2 = tpu.matmul %0, %1, %cst {dimension_numbers = #tpu.dot_dimension_numbers<[1], [0], [0], [1], [0, 0, 1, 1], [], []>} : vector<8x16xf32>, vector<16x128xf32>, vector<8x128xf32> -> vector<8x128xf32>
    %c0_3 = arith.constant 0 : index
    %c0_4 = arith.constant 0 : index
    %3 = vector.load %arg3[%c0_3, %c0_4] : memref<1x128xf32, #tpu.memory_space<vmem>>, vector<1x128xf32>
    %4 = vector.broadcast %3 : vector<1x128xf32> to vector<8x128xf32>
    %5 = arith.addf %2, %4 : vector<8x128xf32>
    %cst_5 = arith.constant 0.000000e+00 : f32
    %6 = vector.broadcast %cst_5 : f32 to vector<8x128xf32>
    %7 = arith.maximumf %5, %6 : vector<8x128xf32>
    %c0_6 = arith.constant 0 : index
    %c0_7 = arith.constant 0 : index
    %8 = vector.load %arg4[%c0_6, %c0_7] : memref<128x128xf32, #tpu.memory_space<vmem>>, vector<128x128xf32>
    %cst_8 = arith.constant dense<0.000000e+00> : vector<8x128xf32>
    %9 = tpu.matmul %7, %8, %cst_8 {dimension_numbers = #tpu.dot_dimension_numbers<[1], [0], [0], [1], [0, 0, 1, 1], [], []>} : vector<8x128xf32>, vector<128x128xf32>, vector<8x128xf32> -> vector<8x128xf32>
    %c0_9 = arith.constant 0 : index
    %c0_10 = arith.constant 0 : index
    %10 = vector.load %arg5[%c0_9, %c0_10] : memref<1x128xf32, #tpu.memory_space<vmem>>, vector<1x128xf32>
    %11 = vector.broadcast %10 : vector<1x128xf32> to vector<8x128xf32>
    %12 = arith.addf %9, %11 : vector<8x128xf32>
    %cst_11 = arith.constant 0.000000e+00 : f32
    %13 = vector.broadcast %cst_11 : f32 to vector<8x128xf32>
    %14 = arith.maximumf %12, %13 : vector<8x128xf32>
    %c0_12 = arith.constant 0 : index
    %c0_13 = arith.constant 0 : index
    %15 = vector.load %arg6[%c0_12, %c0_13] : memref<128x16xf32, #tpu.memory_space<vmem>>, vector<128x16xf32>
    %cst_14 = arith.constant dense<0.000000e+00> : vector<8x16xf32>
    %16 = tpu.matmul %14, %15, %cst_14 {dimension_numbers = #tpu.dot_dimension_numbers<[1], [0], [0], [1], [0, 0, 1, 1], [], []>} : vector<8x128xf32>, vector<128x16xf32>, vector<8x16xf32> -> vector<8x16xf32>
    %c0_15 = arith.constant 0 : index
    %c0_16 = arith.constant 0 : index
    %17 = vector.load %arg7[%c0_15, %c0_16] : memref<1x16xf32, #tpu.memory_space<vmem>>, vector<1x16xf32>
    %18 = vector.broadcast %17 : vector<1x16xf32> to vector<8x16xf32>
    %19 = arith.addf %16, %18 : vector<8x16xf32>
    %c0_17 = arith.constant 0 : index
    %c0_18 = arith.constant 0 : index
    %20 = vector.load %arg8[%c0_17, %c0_18] : memref<8x16xf32, #tpu.memory_space<vmem>>, vector<8x16xf32>
    tpu.vector_store %arg8[%c0_17, %c0_18], %19 {strides = array<i32>} : memref<8x16xf32, #tpu.memory_space<vmem>>, vector<8x16xf32>,
    return
  }
  func.func @transform_0(%arg0: i32) -> (i32, i32) {
    %c0_i32 = arith.constant 0 : i32
    %c0_i32_0 = arith.constant 0 : i32
    return %arg0, %c0_i32 : i32, i32
  }
  func.func @transform_1(%arg0: i32) -> (i32, i32) {
    %c0_i32 = arith.constant 0 : i32
    %c0_i32_0 = arith.constant 0 : i32
    %c0_i32_1 = arith.constant 0 : i32
    return %c0_i32, %c0_i32_0 : i32, i32
  }
  func.func @transform_2(%arg0: i32) -> (i32, i32) {
    %c0_i32 = arith.constant 0 : i32
    %c0_i32_0 = arith.constant 0 : i32
    %c0_i32_1 = arith.constant 0 : i32
    return %c0_i32, %c0_i32_0 : i32, i32
  }
  func.func @transform_3(%arg0: i32) -> (i32, i32) {
    %c0_i32 = arith.constant 0 : i32
    %c0_i32_0 = arith.constant 0 : i32
    %c0_i32_1 = arith.constant 0 : i32
    return %c0_i32, %c0_i32_0 : i32, i32
  }
  func.func @transform_4(%arg0: i32) -> (i32, i32) {
    %c0_i32 = arith.constant 0 : i32
    %c0_i32_0 = arith.constant 0 : i32
    %c0_i32_1 = arith.constant 0 : i32
    return %c0_i32, %c0_i32_0 : i32, i32
  }
  func.func @transform_5(%arg0: i32) -> (i32, i32) {
    %c0_i32 = arith.constant 0 : i32
    %c0_i32_0 = arith.constant 0 : i32
    %c0_i32_1 = arith.constant 0 : i32
    return %c0_i32, %c0_i32_0 : i32, i32
  }
  func.func @transform_6(%arg0: i32) -> (i32, i32) {
    %c0_i32 = arith.constant 0 : i32
    %c0_i32_0 = arith.constant 0 : i32
    %c0_i32_1 = arith.constant 0 : i32
    return %c0_i32, %c0_i32_0 : i32, i32
  }
  func.func @transform_7(%arg0: i32) -> (i32, i32) {
    %c0_i32 = arith.constant 0 : i32
    %c0_i32_0 = arith.constant 0 : i32
    return %arg0, %c0_i32 : i32, i32
  }
}

</mosaic_0001>

<bundles_post_ra>
// kernel: forward_dynamics_pallas.1
= control target key start
LH: loop header
LB: loop body
LE: loop exit
PB: predicated region body
PF: predicated region fallthrough
CT: control target
= control target key end

     0   :  { %v423_v0 = vmov 0.0   ;;  %vm424_vm0 = vmmov 0   ;;  %vm36_vm1 = vcmask 130048   ;;  %s624_s1 = inlined_call_operand.vmem [shape: f32[16,128], index: 1, kind: input, shape index: {}]   ;;  %s625_s0 = inlined_call_operand.vmem [shape: f32[8,16], index: 0, kind: input, shape index: {}]   ;;  %s626_s3 = inlined_call_operand.vmem [shape: f32[128,128], index: 3, kind: input, shape index: {}]   ;;  %s627_s5 = inlined_call_operand.vmem [shape: f32[128,16], index: 5, kind: input, shape index: {}]   ;;  %s628_s2 = inlined_call_operand.vmem [shape: f32[1,128], index: 2, kind: input, shape index: {}]   ;;  %s629_s4 = inlined_call_operand.vmem [shape: f32[1,128], index: 4, kind: input, shape index: {}]   ;;  %s630_s6 = inlined_call_operand.vmem [shape: f32[1,16], index: 6, kind: input, shape index: {}]   ;;  %s631_s7 = inlined_call_operand.vmem [shape: f32[8,16], index: 7, kind: output, shape index: {}]  }
   0x1   :  { %344 = vmatprep.subr.mxu0 %v423_v0  ;;  %v28_v1 = vld [vmem:[%s624_s1 + $0x8] sm:$0xff]  ;;  %v27_v2 = vld [vmem:[%s624_s1] sm:$0xff]  ;;  %348 = vmatprep.mubr.msk.f32.mxu0 %vm424_vm0, %v423_v0  ;;  %v126_v4 = vld [vmem:[%s626_s3 + $0x78] sm:$0xff] }
   0x2   :  { %345 = vmatpush3.msra.mxu0 %v28_v1  ;;  %v26_v3 = vld [vmem:[%s625_s0] sm:$0xff]  ;;  %351 = vmatprep.subr.mxu1 %v423_v0  ;;  %v125_v5 = vld [vmem:[%s626_s3 + $0x70] sm:$0xff]  ;;  %v124_v6 = vld [vmem:[%s626_s3 + $0x68] sm:$0xff] }
   0x3   :  { %346 = vmatprep.subr.mxu0 %v423_v0  ;;  %352 = vmatpush3.msra.mxu1 %v126_v4  ;;  %v123_v7 = vld [vmem:[%s626_s3 + $0x60] sm:$0xff]  ;;  %v122_v8 = vld [vmem:[%s626_s3 + $0x58] sm:$0xff]  ;;  %v121_v9 = vld [vmem:[%s626_s3 + $0x50] sm:$0xff] }
   0x4   :  { %347 = vmatpush3.msra.mxu0 %v27_v2  ;;  %353 = vmatprep.subr.mxu1 %v423_v0  ;;  %v120_v10 = vld [vmem:[%s626_s3 + $0x48] sm:$0xff]  ;;  %v119_v11 = vld [vmem:[%s626_s3 + $0x40] sm:$0xff]  ;;  %v118_v12 = vld [vmem:[%s626_s3 + $0x38] sm:$0xff] }
   0x5   :  { %349 = vmatmul.mubr.msk.f32.vlgmr.msra.gmra.mxu0 %vm36_vm1, %v26_v3  ;;  %354 = vmatpush3.msra.mxu1 %v125_v5  ;;  %v117_v13 = vld [vmem:[%s626_s3 + $0x30] sm:$0xff]  ;;  %v116_v14 = vld [vmem:[%s626_s3 + $0x28] sm:$0xff]  ;;  %v115_v15 = vld [vmem:[%s626_s3 + $0x20] sm:$0xff] }
   0x6   :  { %355 = vmatprep.subr.mxu1 %v423_v0  ;;  %383 = vmatprep.mubr.msk.f32.mxu1 %vm424_vm0, %v423_v0  ;;  %v114_v16 = vld [vmem:[%s626_s3 + $0x18] sm:$0xff]  ;;  %v113_v17 = vld [vmem:[%s626_s3 + $0x10] sm:$0xff]  ;;  %v112_v18 = vld [vmem:[%s626_s3 + $0x8] sm:$0xff] }
   0x7   :  { %356 = vmatpush3.msra.mxu1 %v124_v6  ;;  %386 = vmatprep.subr.mxu0 %v423_v0  ;;  %v111_v19 = vld [vmem:[%s626_s3] sm:$0xff]  ;;  %v220_v20 = vld [vmem:[%s627_s5 + $0x78] sm:$0xff]  ;;  %v219_v21 = vld [vmem:[%s627_s5 + $0x70] sm:$0xff] }
   0x8   :  { %357 = vmatprep.subr.mxu1 %v423_v0  ;;  %418 = vmatprep.mubr.msk.f32.mxu0 %vm424_vm0, %v423_v0  ;;  %v218_v22 = vld [vmem:[%s627_s5 + $0x68] sm:$0xff]  ;;  %v217_v23 = vld [vmem:[%s627_s5 + $0x60] sm:$0xff]  ;;  %v216_v24 = vld [vmem:[%s627_s5 + $0x58] sm:$0xff] }
   0x9   :  { %358 = vmatpush3.msra.mxu1 %v123_v7  ;;  %387 = vmatpush3.msra.mxu0 %v220_v20  ;;  %v215_v25 = vld [vmem:[%s627_s5 + $0x50] sm:$0xff]  ;;  %v214_v26 = vld [vmem:[%s627_s5 + $0x48] sm:$0xff]  ;;  %v213_v27 = vld [vmem:[%s627_s5 + $0x40] sm:$0xff] }
   0xa   :  { %359 = vmatprep.subr.mxu1 %v423_v0  ;;  %388 = vmatprep.subr.mxu0 %v423_v0  ;;  %v212_v28 = vld [vmem:[%s627_s5 + $0x38] sm:$0xff]  ;;  %v211_v29 = vld [vmem:[%s627_s5 + $0x30] sm:$0xff]  ;;  %v210_v30 = vld [vmem:[%s627_s5 + $0x28] sm:$0xff] }
   0xb   :  { %360 = vmatpush3.msra.mxu1 %v122_v8  ;;  %389 = vmatpush3.msra.mxu0 %v219_v21  ;;  %v209_v31 = vld [vmem:[%s627_s5 + $0x20] sm:$0xff]  ;;  %v208_v32 = vld [vmem:[%s627_s5 + $0x18] sm:$0xff]  ;;  %v207_v38 = vld [vmem:[%s627_s5 + $0x10] sm:$0xff] }
   0xc   :  { %361 = vmatprep.subr.mxu1 %v423_v0  ;;  %390 = vmatprep.subr.mxu0 %v423_v0  ;;  %v303_v33 = vld [vmem:[%s628_s2] ss:$0 sm:$0xff]  ;;  %v206_v39 = vld [vmem:[%s627_s5 + $0x8] sm:$0xff] }
   0xd   :  { %362 = vmatpush3.msra.mxu1 %v121_v9  ;;  %391 = vmatpush3.msra.mxu0 %v218_v22  ;;  %v205_v40 = vld [vmem:[%s627_s5] sm:$0xff] }
   0xe   :  { %363 = vmatprep.subr.mxu1 %v423_v0  ;;  %392 = vmatprep.subr.mxu0 %v423_v0  ;;  %v305_v41 = vld [vmem:[%s629_s4] ss:$0 sm:$0xff] }
   0xf   :  { %364 = vmatpush3.msra.mxu1 %v120_v10  ;;  %393 = vmatpush3.msra.mxu0 %v217_v23  ;;  %v306_v46 = vld [vmem:[%s630_s6] ss:$0 sm:$0xff] }
  0x10   :  { %365 = vmatprep.subr.mxu1 %v423_v0  ;;  %394 = vmatprep.subr.mxu0 %v423_v0 }
  0x11   :  { %366 = vmatpush3.msra.mxu1 %v119_v11  ;;  %395 = vmatpush3.msra.mxu0 %v216_v24 }
  0x12   :  { %367 = vmatprep.subr.mxu1 %v423_v0  ;;  %396 = vmatprep.subr.mxu0 %v423_v0 }
  0x13   :  { %368 = vmatpush3.msra.mxu1 %v118_v12  ;;  %397 = vmatpush3.msra.mxu0 %v215_v25 }
  0x14   :  { %369 = vmatprep.subr.mxu1 %v423_v0  ;;  %398 = vmatprep.subr.mxu0 %v423_v0 }
  0x15   :  { %370 = vmatpush3.msra.mxu1 %v117_v13  ;;  %399 = vmatpush3.msra.mxu0 %v214_v26 }
  0x16   :  { %371 = vmatprep.subr.mxu1 %v423_v0  ;;  %400 = vmatprep.subr.mxu0 %v423_v0 }
  0x17   :  { %372 = vmatpush3.msra.mxu1 %v116_v14  ;;  %401 = vmatpush3.msra.mxu0 %v213_v27 }
  0x18   :  { %373 = vmatprep.subr.mxu1 %v423_v0  ;;  %402 = vmatprep.subr.mxu0 %v423_v0 }
  0x19   :  { %374 = vmatpush3.msra.mxu1 %v115_v15  ;;  %403 = vmatpush3.msra.mxu0 %v212_v28 }
  0x1a   :  { %375 = vmatprep.subr.mxu1 %v423_v0  ;;  %404 = vmatprep.subr.mxu0 %v423_v0 }
  0x1b   :  { %376 = vmatpush3.msra.mxu1 %v114_v16  ;;  %405 = vmatpush3.msra.mxu0 %v211_v29 }
  0x1c   :  { %377 = vmatprep.subr.mxu1 %v423_v0  ;;  %406 = vmatprep.subr.mxu0 %v423_v0 }
  0x1d   :  { %378 = vmatpush3.msra.mxu1 %v113_v17  ;;  %407 = vmatpush3.msra.mxu0 %v210_v30 }
  0x1e   :  { %379 = vmatprep.subr.mxu1 %v423_v0  ;;  %408 = vmatprep.subr.mxu0 %v423_v0 }
  0x1f   :  { %380 = vmatpush3.msra.mxu1 %v112_v18  ;;  %409 = vmatpush3.msra.mxu0 %v209_v31 }
  0x20   :  { %381 = vmatprep.subr.mxu1 %v423_v0  ;;  %410 = vmatprep.subr.mxu0 %v423_v0 }
  0x21   :  { %382 = vmatpush3.msra.mxu1 %v111_v19  ;;  %411 = vmatpush3.msra.mxu0 %v208_v32 }
  0x22   :  { %412 = vmatprep.subr.mxu0 %v423_v0 }
  0x23   :  { %413 = vmatpush3.msra.mxu0 %v207_v38 }
  0x24   :  { %414 = vmatprep.subr.mxu0 %v423_v0 }
  0x25   :  { %415 = vmatpush3.msra.mxu0 %v206_v39 }
  0x26   :  { %416 = vmatprep.subr.mxu0 %v423_v0 }
  0x27   :  { %417 = vmatpush3.msra.mxu0 %v205_v40 }
  0xc5   :  { %v106_v34 = vpop.f32.mrf.mxu0 }
  0xc6   :  { %v107_v35 = vadd.f32 %v303_v33, %v106_v34 }
  0xc7   :  { %v350_v36 = vpop.f32.mrf.mxu0 }
  0xc8   :  { %v110_v37 = vmax.f32 %v107_v35, 0.0 }
  0xca   :  { %384 = vmatmul.mubr.f32.vlgmr.msra.gmra.mxu1 %v110_v37 }
 0x18a   :  { %v200_v42 = vpop.f32.mrf.mxu1 }
 0x18b   :  { %v201_v43 = vadd.f32 %v305_v41, %v200_v42 }
 0x18c   :  { %v385_v44 = vpop.f32.mrf.mxu1 }
 0x18d   :  { %v204_v45 = vmax.f32 %v201_v43, 0.0 }
 0x18f   :  { %419 = vmatmul.mubr.f32.vlgmr.msra.gmra.mxu0 %v204_v45 }
 0x24f   :  { %v294_v47 = vpop.f32.mrf.mxu0 }
 0x250   :  { %v295_v48 = vadd.f32 %v306_v46, %v294_v47 }
 0x251   :  { %v420_v49 = vpop.f32.mrf.mxu0 }
 0x252   :  { %298 = vst.msk [vmem:[%s631_s7] sm:$0xff] %vm36_vm1, %v295_v48 }

</bundles_post_ra>
